<compile_context>
chip_gen: v5e
topology: v5e:2x2
jax: 0.10.0
libtpu: 0.0.40
codegen_flags: <defaults>
</compile_context>

<pallas_src>
import math

import jax
import jax.numpy as jnp
from jax import lax
from jax.experimental import pallas as pl
from jax.experimental.pallas import tpu as pltpu


# ----------------------------------------------------------------------------
# Pallas kernel: lane-dense GEMM + bias,  out(E, TN) = W(E, Kd) @ P(Kd, TN) + b
# ----------------------------------------------------------------------------
def _patch_embed_gemm_kernel(w_ref, b_ref, p_ref, o_ref):
    # w_ref: (E, Kd) bf16 (VMEM-resident)   b_ref: (E, 1) f32 (resident)
    # p_ref: (Kd, TN) bf16 tile             o_ref: (E, TN) f32 tile
    acc = jnp.dot(w_ref[...], p_ref[...], preferred_element_type=jnp.float32)
    o_ref[...] = acc + b_ref[...]


def _patch_embed_gemm(w_packed, bias_col, patches):
    """out[b] = w_packed @ patches[b] + bias   ->  (B, E, Npix) float32 (NCHW-flat)."""
    B, Kd, Npix = patches.shape
    E = w_packed.shape[0]

    # Pixel-tile size: full extent when small, else a lane-aligned 1024 tile
    # (fits v7x VMEM with double buffering, amortizes pipeline overhead on v5e).
    TN = Npix if Npix <= 1024 else 1024
    grid = (B, pl.cdiv(Npix, TN))

    cost = pl.CostEstimate(
        flops=2 * B * E * Kd * Npix,
        transcendentals=0,
        bytes_accessed=(patches.size * patches.dtype.itemsize
                        + B * E * Npix * 4
                        + w_packed.size * w_packed.dtype.itemsize
                        + bias_col.size * 4),
    )

    return pl.pallas_call(
        _patch_embed_gemm_kernel,
        out_shape=jax.ShapeDtypeStruct((B, E, Npix), jnp.float32),
        grid=grid,
        in_specs=[
            pl.BlockSpec((E, Kd), lambda b, n: (0, 0)),            # weight: resident
            pl.BlockSpec((E, 1), lambda b, n: (0, 0)),             # bias:   resident
            pl.BlockSpec((None, Kd, TN), lambda b, n: (b, 0, n)),  # patch tile
        ],
        out_specs=pl.BlockSpec((None, E, TN), lambda b, n: (b, 0, n)),
        compiler_params=pltpu.CompilerParams(
            dimension_semantics=("parallel", "parallel")),
        cost_estimate=cost,
    )(w_packed, bias_col, patches)


# ----------------------------------------------------------------------------
# PatchEmbed module (parameters held as plain arrays)
# ----------------------------------------------------------------------------
class PatchEmbed:
    def __init__(self, patch_size=4, in_chans=3, embed_dim=96, kernel_size=None,
                 key=jax.random.PRNGKey(0)):
        self.in_chans = in_chans
        self.embed_dim = embed_dim
        self.patch_size = patch_size
        if kernel_size is None:
            kernel_size = patch_size
        assert kernel_size >= patch_size, \
            "reflect padding requires kernel_size >= patch_size"
        self.kernel_size = kernel_size
        self.padding = (kernel_size - patch_size + 1) // 2  # reflect padding

        # Deterministic init mimicking nn.Conv2d defaults (kaiming-uniform-ish).
        kw, kb = jax.random.split(key)
        fan_in = in_chans * kernel_size * kernel_size
        bound = 1.0 / math.sqrt(fan_in)
        # weight layout matches PyTorch: (E, C, Kh, Kw)
        self.weight = jax.random.uniform(
            kw, (embed_dim, in_chans, kernel_size, kernel_size),
            jnp.float32, -bound, bound)
        self.bias = jax.random.uniform(kb, (embed_dim,), jnp.float32, -bound, bound)

        # Pre-packed GEMM operands (built once, not per call): bf16 weight, f32 bias.
        self.w_packed = self.weight.reshape(embed_dim, fan_in).astype(jnp.bfloat16)
        self.bias_col = self.bias.reshape(embed_dim, 1).astype(jnp.float32)

    def __call__(self, x):
        # x: (B, C, H, W) NCHW float32
        B, C, H, W = x.shape
        K, S, p = self.kernel_size, self.patch_size, self.padding
        E = self.embed_dim

        if p > 0:
            # PyTorch 'reflect' == numpy/jnp 'reflect' (no edge repeat).
            x = jnp.pad(x, ((0, 0), (0, 0), (p, p), (p, p)), mode="reflect")
        Hp, Wp = H + 2 * p, W + 2 * p
        Ho = (Hp - K) // S + 1
        Wo = (Wp - K) // S + 1

        # Patch extraction directly into the lane-dense layout (B, C*K*K, Ho*Wo),
        # rows ordered (c, kh, kw) to match weight.reshape(E, C*K*K).
        if K == S and p == 0:
            # Non-overlapping blocking: one reshape/transpose.
            patches = (x.reshape(B, C, Ho, S, Wo, S)
                        .transpose(0, 1, 3, 5, 2, 4)
                        .reshape(B, C * K * K, Ho * Wo))
        else:
            # General (overlapping) case: strided-slice im2col.
            cols = []
            for kh in range(K):
                for kw_ in range(K):
                    cols.append(x[:, :, kh:kh + S * Ho:S, kw_:kw_ + S * Wo:S])
            patches = jnp.stack(cols, axis=2).reshape(B, C * K * K, Ho * Wo)

        patches = patches.astype(jnp.bfloat16)

        out = _patch_embed_gemm(self.w_packed, self.bias_col, patches)  # (B, E, Ho*Wo) f32
        return out.reshape(B, E, Ho, Wo)                                # NCHW, no transpose


# ----------------------------------------------------------------------------
# Main
# ----------------------------------------------------------------------------
if __name__ == "__main__":
    key = jax.random.PRNGKey(0)
    kx, kp = jax.random.split(key)

    B, C, H, W = 2, 3, 16, 16
    x = jax.random.normal(kx, (B, C, H, W), jnp.float32)

    model = PatchEmbed(patch_size=4, in_chans=C, embed_dim=96, key=kp)

    fwd = jax.jit(model.__call__)
    y = jax.block_until_ready(fwd(x))

    S, p = model.patch_size, model.padding
    assert y.shape == (B, model.embed_dim, H // S, W // S), y.shape

    x_pad = x if p == 0 else jnp.pad(x, ((0, 0), (0, 0), (p, p), (p, p)), mode="reflect")

    # Tight check vs. an identically-quantized XLA conv (bf16 inputs, f32 accumulation).
    ref_bf16 = lax.conv_general_dilated(
        x_pad.astype(jnp.bfloat16), model.weight.astype(jnp.bfloat16),
        window_strides=(S, S), padding=[(0, 0), (0, 0)],
        dimension_numbers=("NCHW", "OIHW", "NCHW"),
        preferred_element_type=jnp.float32,
    ) + model.bias.reshape(1, -1, 1, 1)
    assert jnp.allclose(y, ref_bf16, atol=2e-3, rtol=2e-3), \
        float(jnp.max(jnp.abs(y - ref_bf16)))

    # Loose sanity check vs. the exact f32 conv (difference = bf16 input quantization).
    ref_f32 = lax.conv_general_dilated(
        x_pad, model.weight, window_strides=(S, S), padding=[(0, 0), (0, 0)],
        dimension_numbers=("NCHW", "OIHW", "NCHW"),
    ) + model.bias.reshape(1, -1, 1, 1)
    assert jnp.allclose(y, ref_f32, atol=5e-2, rtol=5e-2), \
        float(jnp.max(jnp.abs(y - ref_f32)))

    print("KERNEL_OK")
</pallas_src>

<mosaic_0001>
module attributes {stable_mosaic.version = 11 : i64} {
  func.func @_patch_embed_gemm_kernel(%arg0: i32, %arg1: i32, %arg2: memref<96x48xbf16, #tpu.memory_space<vmem>>, %arg3: memref<96x1xf32, #tpu.memory_space<vmem>>, %arg4: memref<1x48x16xbf16, #tpu.memory_space<vmem>>, %arg5: memref<1x96x16xf32, #tpu.memory_space<vmem>>) attributes {dimension_semantics = [#tpu.dimension_semantics<parallel>, #tpu.dimension_semantics<parallel>], iteration_bounds = array<i64: 2, 1>, scalar_prefetch = 0 : i64, scratch_operands = 0 : i64, tpu.core_type = #tpu.core_type<tc>, window_params = [{pipeline_mode = #tpu.pipeline_mode<synchronous>, transform_indices = @transform_0, window_bounds = array<i64: 96, 48>}, {pipeline_mode = #tpu.pipeline_mode<synchronous>, transform_indices = @transform_1, window_bounds = array<i64: 96, 1>}, {transform_indices = @transform_2, window_bounds = array<i64: 1, 48, 16>}, {transform_indices = @transform_3, window_bounds = array<i64: 1, 96, 16>}]} {
    %c0 = arith.constant 0 : index
    %c0_0 = arith.constant 0 : index
    %0 = vector.load %arg2[%c0, %c0_0] : memref<96x48xbf16, #tpu.memory_space<vmem>>, vector<96x48xbf16>
    %c0_1 = arith.constant 0 : index
    %c0_2 = arith.constant 0 : index
    %c0_3 = arith.constant 0 : index
    %1 = vector.load %arg4[%c0_1, %c0_2, %c0_3] : memref<1x48x16xbf16, #tpu.memory_space<vmem>>, vector<1x48x16xbf16>
    %2 = vector.shape_cast %1 : vector<1x48x16xbf16> to vector<48x16xbf16>
    %cst = arith.constant dense<0.000000e+00> : vector<96x16xf32>
    %3 = tpu.matmul %0, %2, %cst {dimension_numbers = #tpu.dot_dimension_numbers<[1], [0], [0], [1], [0, 0, 1, 1], [], []>} : vector<96x48xbf16>, vector<48x16xbf16>, vector<96x16xf32> -> vector<96x16xf32>
    %c0_4 = arith.constant 0 : index
    %c0_5 = arith.constant 0 : index
    %4 = vector.load %arg3[%c0_4, %c0_5] : memref<96x1xf32, #tpu.memory_space<vmem>>, vector<96x1xf32>
    %5 = vector.broadcast %4 : vector<96x1xf32> to vector<96x16xf32>
    %6 = arith.addf %3, %5 : vector<96x16xf32>
    %c0_6 = arith.constant 0 : index
    %c0_7 = arith.constant 0 : index
    %c0_8 = arith.constant 0 : index
    %7 = vector.load %arg5[%c0_6, %c0_7, %c0_8] : memref<1x96x16xf32, #tpu.memory_space<vmem>>, vector<1x96x16xf32>
    %8 = vector.shape_cast %7 : vector<1x96x16xf32> to vector<96x16xf32>
    %9 = vector.shape_cast %6 : vector<96x16xf32> to vector<1x96x16xf32>
    tpu.vector_store %arg5[%c0_6, %c0_7, %c0_8], %9 {strides = array<i32>} : memref<1x96x16xf32, #tpu.memory_space<vmem>>, vector<1x96x16xf32>,
    return
  }
  func.func @transform_0(%arg0: i32, %arg1: i32) -> (i32, i32) {
    %c0_i32 = arith.constant 0 : i32
    %c0_i32_0 = arith.constant 0 : i32
    %c0_i32_1 = arith.constant 0 : i32
    return %c0_i32, %c0_i32_0 : i32, i32
  }
  func.func @transform_1(%arg0: i32, %arg1: i32) -> (i32, i32) {
    %c0_i32 = arith.constant 0 : i32
    %c0_i32_0 = arith.constant 0 : i32
    %c0_i32_1 = arith.constant 0 : i32
    return %c0_i32, %c0_i32_0 : i32, i32
  }
  func.func @transform_2(%arg0: i32, %arg1: i32) -> (i32, i32, i32) {
    %c0_i32 = arith.constant 0 : i32
    %c0_i32_0 = arith.constant 0 : i32
    return %arg0, %c0_i32, %arg1 : i32, i32, i32
  }
  func.func @transform_3(%arg0: i32, %arg1: i32) -> (i32, i32, i32) {
    %c0_i32 = arith.constant 0 : i32
    %c0_i32_0 = arith.constant 0 : i32
    return %arg0, %c0_i32, %arg1 : i32, i32, i32
  }
}

</mosaic_0001>

<bundles_post_ra>
// kernel: a_call__.1
= control target key start
LH: loop header
LB: loop body
LE: loop exit
PB: predicated region body
PF: predicated region fallthrough
CT: control target
= control target key end

     0   :  { %s639_s12 = smov 0   ;;  %s641_s13 = smov 0   ;;  %s762_s0 = inlined_call_operand.vmem [shape: bf16[96,48], index: 0, kind: input, shape index: {}]   ;;  %s763_s1 = inlined_call_operand.vmem [shape: f32[96,1], index: 1, kind: input, shape index: {}]   ;;  %s764_s2 = inlined_call_operand.vmem [shape: bf16[2,48,16], index: 2, kind: input, shape index: {}]   ;;  %s765_s3 = inlined_call_operand.vmem [shape: f32[2,96,16], index: 3, kind: output, shape index: {}]  }
   0x1   :  { %s643_s14 = smov 0  }
   0x2 LB: > { %s25_s15 = sadd.s32 1, %s612_s13  ;;  %p499_p0 = scmp.ge.s32.totalorder %s616_s14, 1  ;;  %s616_s14 = sphi %s643_s14, %s13_s14   ;;  %s612_s13 = sphi %s641_s13, %s767_s13   ;;  %s608_s12 = sphi %s639_s12, %s766_s12  }
   0x3   : > { %p27_p1 = scmp.ge.s32.totalorder %s25_s15, 2  ;;  %p156_p2 = scmp.lt.s32.totalorder %s616_s14, 3 }
   0x5   : > { %s769_s15 = smov (%p27_p1, %s25_s15), 0  ;;  %p157_p3 = pnand %p499_p0, %p156_p2 }
   0x6   : > { %p186_p4 = scmp.lt.s32.totalorder (!%p157_p3), %s608_s12, 1 }
   0x7   : > { %160 = sbr.rel (%p157_p3) target bundleno = 190 (0xbe), region = 32 }
   0xc   : > { %v223_v0 = vld [vmem:[%s763_s1 + $0x10] sm:$0xff]  ;;  %v221_v1 = vld [vmem:[%s763_s1] sm:$0xff]  ;;  %v618_v2 = vmov 0   ;;  %s771_s12 = smov (!%p186_p4, %s608_s12), 1  ;;  %v224_v5 = vld [vmem:[%s763_s1 + $0x18] sm:$0xff]  ;;  %vm341_vm0 = vcmask 392192  }
   0xd   : > { %592 = vset.pattern.permute.xlu1 %v618_v2  ;;  %591 = vset.pattern.permute.xlu0 %v618_v2  ;;  %s564_s20 = smul.u32 24, %s771_s12  ;;  %v225_v3 = vld [vmem:[%s763_s1 + $0x20] sm:$0xff]  ;;  %v222_v6 = vld [vmem:[%s763_s1 + $0x8] sm:$0xff]  ;;  %v228_v12 = vld [vmem:[%s763_s1 + $0x38] sm:$0xff]  ;;  %vm399_vm1 = vcmask 130048  }
   0xe   : > { %245 = vperm.xlu1 %592, %v223_v0   ;;  %235 = vperm.xlu0 %591, %v221_v1   ;;  %v226_v8 = vld [vmem:[%s763_s1 + $0x28] sm:$0xff]  ;;  %v546_v10 = vld [vmem:[%s762_s0] sm:$0xff]  ;;  %v227_v13 = vld [vmem:[%s763_s1 + $0x30] sm:$0xff]  ;;  %s565_s6 = smul.u32 96, %s771_s12 }
   0xf   : > { %593 = vset.pattern.permute.xlu2 %v618_v2  ;;  %s193_s25 = scalar_lea.vmem %s764_s2, %s564_s20  ;;  %v547_v11 = vld [vmem:[%s762_s0 + $0x8] sm:$0xff]  ;;  %v549_v14 = vld [vmem:[%s762_s0 + $0x18] sm:$0xff]  ;;  %v229_v16 = vld [vmem:[%s763_s1 + $0x40] sm:$0xff] }
  0x10   : > { %255 = vperm.xlu2 %593, %v225_v3   ;;  %v554_v4 = vld [vmem:[%s193_s25 + $0x10] sm:$0xff]  ;;  %v553_v7 = vld [vmem:[%s193_s25 + $0x8] sm:$0xff]  ;;  %v552_v9 = vld [vmem:[%s193_s25] sm:$0xff]  ;;  %s727_s9 = scalar_lea.vmem %s765_s3, %s565_s6 }
  0x11   : > { %365 = vmatpush.bf16.msra.mxu0 %v554_v4  ;;  %555 = vmatpush.bf16.msra.mxu1 %v554_v4  ;;  %v551_v15 = vld [vmem:[%s762_s0 + $0x28] sm:$0xff]  ;;  %v231_v17 = vld [vmem:[%s763_s1 + $0x50] sm:$0xff]  ;;  %v232_v19 = vld [vmem:[%s763_s1 + $0x58] sm:$0xff] }
  0x12   : > { %556 = vmatpush.bf16.msra.mxu2 %v554_v4  ;;  %557 = vmatpush.bf16.msra.mxu3 %v554_v4  ;;  %v230_v18 = vld [vmem:[%s763_s1 + $0x48] sm:$0xff]  ;;  %v548_v20 = vld [vmem:[%s762_s0 + $0x10] sm:$0xff]  ;;  %v550_v21 = vld [vmem:[%s762_s0 + $0x20] sm:$0xff] }
  0x15   : > { %366 = vmatpush.bf16.msra.mxu0 %v553_v7  ;;  %558 = vmatpush.bf16.msra.mxu1 %v553_v7 }
  0x16   : > { %250 = vperm.xlu1 %592, %v224_v5   ;;  %240 = vperm.xlu0 %591, %v222_v6  }
  0x17   : > { %559 = vmatpush.bf16.msra.mxu2 %v553_v7  ;;  %560 = vmatpush.bf16.msra.mxu3 %v553_v7 }
  0x18   : > { %260 = vperm.xlu2 %593, %v226_v8  }
  0x19   : > { %367 = vmatpush.bf16.msra.mxu0 %v552_v9  ;;  %561 = vmatpush.bf16.msra.mxu1 %v552_v9 }
  0x1b   : > { %562 = vmatpush.bf16.msra.mxu2 %v552_v9  ;;  %563 = vmatpush.bf16.msra.mxu3 %v552_v9 }
  0x1c   : > { %538 = vmatmul.msk.bf16.vlgmr.msra.gmra.mxu0 %vm341_vm0, %v546_v10  ;;  %539 = vmatmul.msk.bf16.vlgmr.msra.gmra.mxu1 %vm341_vm0, %v547_v11 }
  0x1e   : > { %270 = vperm.xlu1 %592, %v228_v12   ;;  %265 = vperm.xlu0 %591, %v227_v13  }
  0x1f   : > { %541 = vmatmul.msk.bf16.vlgmr.msra.gmra.mxu2 %vm341_vm0, %v549_v14  ;;  %543 = vmatmul.msk.bf16.vlgmr.msra.gmra.mxu3 %vm341_vm0, %v551_v15 }
  0x20   : > { %275 = vperm.xlu2 %593, %v229_v16  }
  0x26   : > { %285 = vperm.xlu1 %592, %v231_v17   ;;  %280 = vperm.xlu0 %591, %v230_v18  }
  0x28   : > { %290 = vperm.xlu2 %593, %v232_v19  }
  0x2c   : > { %540 = vmatmul.msk.bf16.gmra.mxu1 %vm341_vm0, %v548_v20 }
  0x2f   : > { %542 = vmatmul.msk.bf16.gmra.mxu2 %vm341_vm0, %v550_v21 }
  0x6a   : > { %v256_v23 = vpop.permute.xlu2 %255 }
  0x72   : > { %v261_v26 = vpop.permute.xlu2 %260 }
  0x7a   : > { %v276_v33 = vpop.permute.xlu2 %275 }
  0x80   : > { %v246_v22 = vpop.permute.xlu1 %245  ;;  %v236_v25 = vpop.permute.xlu0 %235 }
  0x82   : > { %v291_v44 = vpop.permute.xlu2 %290 }
  0x88   : > { %v251_v24 = vpop.permute.xlu1 %250  ;;  %v241_v28 = vpop.permute.xlu0 %240 }
  0x90   : > { %v271_v27 = vpop.permute.xlu1 %270  ;;  %v266_v35 = vpop.permute.xlu0 %265 }
  0x98   : > { %v286_v34 = vpop.permute.xlu1 %285  ;;  %v281_v55 = vpop.permute.xlu0 %280 }
  0x99   : > { %v369_v29 = vpop.f32.mrf.mxu0  ;;  %v374_v30 = vpop.f32.mrf.mxu1 }
  0x9a   : > { %v370_v31 = vadd.f32 %v369_v29, %v236_v25  ;;  %v375_v32 = vadd.f32 %v374_v30, %v246_v22 }
  0x9c   : > { %400 = vst.msk [vmem:[%s727_s9] sm:$0xff] %vm399_vm1, %v370_v31 }
  0x9d   : > { %402 = vst.msk [vmem:[%s727_s9 + $0x10] sm:$0xff] %vm399_vm1, %v375_v32 }
  0xa1   : > { %v371_v40 = vpop.f32.mrf.mxu0  ;;  %v376_v41 = vpop.f32.mrf.mxu1 }
  0xa2   : > { %v384_v36 = vpop.f32.mrf.mxu2  ;;  %v394_v37 = vpop.f32.mrf.mxu3  ;;  %v372_v42 = vadd.f32 %v371_v40, %v241_v28  ;;  %v377_v43 = vadd.f32 %v376_v41, %v251_v24 }
  0xa3   : > { %v385_v38 = vadd.f32 %v384_v36, %v266_v35  ;;  %v395_v39 = vadd.f32 %v394_v37, %v286_v34 }
  0xa4   : > { %401 = vst.msk [vmem:[%s727_s9 + $0x8] sm:$0xff] %vm399_vm1, %v372_v42 }
  0xa5   : > { %406 = vst.msk [vmem:[%s727_s9 + $0x30] sm:$0xff] %vm399_vm1, %v385_v38 }
  0xa6   : > { %410 = vst.msk [vmem:[%s727_s9 + $0x50] sm:$0xff] %vm399_vm1, %v395_v39 }
  0xa7   : > { %403 = vst.msk [vmem:[%s727_s9 + $0x18] sm:$0xff] %vm399_vm1, %v377_v43 }
  0xa9   : > { %v379_v49 = vpop.f32.mrf.mxu1 }
  0xaa   : > { %v386_v45 = vpop.f32.mrf.mxu2  ;;  %v396_v46 = vpop.f32.mrf.mxu3  ;;  %v380_v50 = vadd.f32 %v379_v49, %v256_v23 }
  0xab   : > { %v387_v47 = vadd.f32 %v386_v45, %v271_v27  ;;  %v397_v48 = vadd.f32 %v396_v46, %v291_v44 }
  0xac   : > { %404 = vst.msk [vmem:[%s727_s9 + $0x20] sm:$0xff] %vm399_vm1, %v380_v50 }
  0xad   : > { %407 = vst.msk [vmem:[%s727_s9 + $0x38] sm:$0xff] %vm399_vm1, %v387_v47 }
  0xae   : > { %411 = vst.msk [vmem:[%s727_s9 + $0x58] sm:$0xff] %vm399_vm1, %v397_v48 }
  0xb1   : > { %v381_v53 = vpop.f32.mrf.mxu1 }
  0xb2   : > { %v389_v51 = vpop.f32.mrf.mxu2  ;;  %v382_v54 = vadd.f32 %v381_v53, %v261_v26 }
  0xb3   : > { %v390_v52 = vadd.f32 %v389_v51, %v276_v33 }
  0xb4   : > { %405 = vst.msk [vmem:[%s727_s9 + $0x28] sm:$0xff] %vm399_vm1, %v382_v54 }
  0xb5   : > { %408 = vst.msk [vmem:[%s727_s9 + $0x40] sm:$0xff] %vm399_vm1, %v390_v52 }
  0xba   : > { %v391_v56 = vpop.f32.mrf.mxu2 }
  0xbb   : > { %v392_v57 = vadd.f32 %v391_v56, %v281_v55 }
  0xbd   : > { %409 = vst.msk [vmem:[%s727_s9 + $0x48] sm:$0xff] %vm399_vm1, %v392_v57 }
  0xbe PF: > { %s13_s14 = sadd.s32 1, %s616_s14   ;;  %s766_s12 = smov %s612_s13 }
  0xbf   : > { %p10_p5 = scmp.ge.s32.totalorder %s13_s14, 4   ;;  %s767_s13 = smov %s769_s15 }
  0xc1   :  { %12 = sbr.rel (!%p10_p5) target bundleno = 2 (0x2), region = 62 }

</bundles_post_ra>
